<compile_context>
chip_gen: v7x
topology: tpu7x:2x2x1
jax: 0.10.0
libtpu: 0.0.40
codegen_flags: <defaults>
</compile_context>

<pallas_src>
import functools

import jax
import jax.numpy as jnp
from jax import lax
from jax.experimental import pallas as pl
from jax.experimental.pallas import tpu as pltpu

_EPS = 1e-8     # matches torch.nn.CosineSimilarity default eps
_NEG = -1e30    # "minus infinity" for masked (diagonal) logits
_LANES = 128    # lane width of the replicated online-softmax state


def _nt_xent_kernel(
    qi_ref, qj_ref, ki_ref, kj_ref,   # normalized matmul_dtype tiles
    out_ref,                          # (2, block_q, 1) per-row losses
    m_i, s_i, m_j, s_j,               # (block_q, 128) replicated online state
    *, temperature, block_q, block_k,
):
    i = pl.program_id(0)
    k = pl.program_id(1)
    nk = pl.num_programs(1)
    inv_temp = 1.0 / temperature

    @pl.when(k == 0)
    def _init():
        m_i[...] = jnp.full_like(m_i, -jnp.inf)
        m_j[...] = jnp.full_like(m_j, -jnp.inf)
        s_i[...] = jnp.zeros_like(s_i)
        s_j[...] = jnp.zeros_like(s_j)

    # The N x N diagonal (global row == global col) only appears in the
    # s_ii / s_jj blocks, and only when this row tile overlaps this col tile.
    rows = i * block_q + lax.broadcasted_iota(jnp.int32, (block_q, block_k), 0)
    cols = k * block_k + lax.broadcasted_iota(jnp.int32, (block_q, block_k), 1)
    diag = rows == cols

    dn = (((1,), (1,)), ((), ()))   # contract the feature dim of both operands

    def _online_update(m_ref, s_ref, a, b):
        # a, b: (block_q, block_k) f32 logits. One lane-max + one lane-sum.
        tile_max = jnp.max(jnp.maximum(a, b), axis=-1, keepdims=True)
        m_prev = m_ref[...]
        m_next = jnp.maximum(m_prev, tile_max)            # (block_q, 128)
        m_col = m_next[:, :1]
        p = jnp.exp(a - m_col) + jnp.exp(b - m_col)
        s_ref[...] = (s_ref[...] * jnp.exp(m_prev - m_next)
                      + jnp.sum(p, axis=-1, keepdims=True))
        m_ref[...] = m_next

    # Query rows taken from z_i.
    s_ii = lax.dot_general(qi_ref[...], ki_ref[...], dn,
                           preferred_element_type=jnp.float32) * inv_temp
    s_ii = jnp.where(diag, _NEG, s_ii)
    s_ij = lax.dot_general(qi_ref[...], kj_ref[...], dn,
                           preferred_element_type=jnp.float32) * inv_temp
    _online_update(m_i, s_i, s_ii, s_ij)

    # Query rows taken from z_j (interleaved to limit live f32 logit tiles).
    s_ji = lax.dot_general(qj_ref[...], ki_ref[...], dn,
                           preferred_element_type=jnp.float32) * inv_temp
    s_jj = lax.dot_general(qj_ref[...], kj_ref[...], dn,
                           preferred_element_type=jnp.float32) * inv_temp
    s_jj = jnp.where(diag, _NEG, s_jj)
    _online_update(m_j, s_j, s_ji, s_jj)

    @pl.when(k == nk - 1)
    def _finalize():
        # Positive logit = cos(z_i[r], z_j[r]) / temperature (same both views).
        qi = qi_ref[...].astype(jnp.float32)
        qj = qj_ref[...].astype(jnp.float32)
        pos = inv_temp * jnp.sum(qi * qj, axis=-1, keepdims=True)  # (block_q, 1)
        lse_i = m_i[:, :1] + jnp.log(s_i[:, :1])
        lse_j = m_j[:, :1] + jnp.log(s_j[:, :1])
        out_ref[0, :, :] = lse_i - pos   # rows coming from z_i
        out_ref[1, :, :] = lse_j - pos   # rows coming from z_j


def _row_normalize(z):
    """z / max(||z||, eps) in f32 (mirrors torch CosineSimilarity)."""
    z = z.astype(jnp.float32)
    ss = jnp.sum(z * z, axis=-1, keepdims=True)
    return z * lax.rsqrt(jnp.maximum(ss, jnp.float32(_EPS * _EPS)))


def _pick_block_q(b):
    # Multiple of 8; prefer >= 2 row tiles so the "parallel" axis can feed both
    # v7x TensorCores; cap at 256 to stay inside v7x's 64 MiB VMEM.
    for t in (256, 128, 64, 32, 16, 8):
        if b % t == 0 and b // t >= 2:
            return t
    for t in (256, 128, 64, 32, 16, 8):
        if b % t == 0:
            return t
    return b


def _pick_block_k(b):
    # Lane dimension of the (block_q, block_k) logit tiles: keep it a multiple
    # of 128 so VPU/EUP/XLU vregs and the MXU result dim are fully used.
    for t in (512, 256, 128):
        if b % t == 0:
            return t
    for t in (64, 32, 16, 8):     # small-batch fallback
        if b % t == 0:
            return t
    return b


def _vmem_limit_bytes(block_q, block_k, d, matmul_dtype):
    isz = jnp.dtype(matmul_dtype).itemsize
    est = (
        2 * 2 * block_q * d * isz        # two query views (double-buffered)
        + 2 * 2 * block_k * d * isz      # two key views (double-buffered)
        + 4 * block_q * _LANES * 4       # m/s online state
        + 6 * block_q * block_k * 4      # live f32 logit / exp temporaries
        + 2 * 2 * block_q * 4            # per-row loss output
    )
    # Headroom, but never below the usual scoped default nor above what the
    # smallest-physical-VMEM generation can reasonably grant.
    return int(min(max(2 * est, 32 * 1024 * 1024), 96 * 1024 * 1024))


def nt_xent_loss(z_i, z_j, temperature=1.0, *, block_q=None, block_k=None,
                 matmul_dtype=jnp.bfloat16):
    """NT-Xent (SimCLR) loss via a tiled Pallas TPU kernel.  z_i, z_j: (B, D)."""
    assert z_i.shape == z_j.shape and z_i.ndim == 2, "expected two (B, D) views"
    b, d = z_i.shape
    n = 2 * b

    block_q = _pick_block_q(b) if block_q is None else block_q
    block_k = _pick_block_k(b) if block_k is None else block_k
    assert b % block_q == 0 and (block_q % 8 == 0 or block_q == b)
    assert b % block_k == 0 and (block_k % 8 == 0 or block_k == b)

    grid = (b // block_q, b // block_k)   # (row tiles [parallel], col tiles [reduction])

    # Normalize ONCE (hoisted out of the kernel's reduction loop) and cast the
    # MXU operands to matmul_dtype; exp/log/accumulation stay f32 in-kernel.
    zi_n = _row_normalize(z_i).astype(matmul_dtype)
    zj_n = _row_normalize(z_j).astype(matmul_dtype)

    kernel = functools.partial(
        _nt_xent_kernel,
        temperature=float(temperature),
        block_q=block_q,
        block_k=block_k,
    )

    q_spec = pl.BlockSpec((block_q, d), lambda i, k: (i, 0))   # query row tile
    k_spec = pl.BlockSpec((block_k, d), lambda i, k: (k, 0))   # key col tile

    per_row = pl.pallas_call(
        kernel,
        out_shape=jax.ShapeDtypeStruct((2, b, 1), jnp.float32),
        grid_spec=pltpu.PrefetchScalarGridSpec(
            num_scalar_prefetch=0,
            grid=grid,
            in_specs=[q_spec, q_spec, k_spec, k_spec],
            out_specs=pl.BlockSpec((2, block_q, 1), lambda i, k: (0, i, 0)),
            scratch_shapes=[
                pltpu.VMEM((block_q, _LANES), jnp.float32),   # running max (z_i rows)
                pltpu.VMEM((block_q, _LANES), jnp.float32),   # running sum (z_i rows)
                pltpu.VMEM((block_q, _LANES), jnp.float32),   # running max (z_j rows)
                pltpu.VMEM((block_q, _LANES), jnp.float32),   # running sum (z_j rows)
            ],
        ),
        compiler_params=pltpu.CompilerParams(
            dimension_semantics=("parallel", "arbitrary"),
            vmem_limit_bytes=_vmem_limit_bytes(block_q, block_k, d, matmul_dtype),
        ),
    )(zi_n, zj_n, zi_n, zj_n)   # each view fed twice: as query rows and key cols

    return jnp.sum(per_row) / jnp.float32(n)


def _reference_loss(z_i, z_j, temperature=1.0):
    """Pure-JAX reference mirroring the PyTorch module (f32 throughout)."""
    b = z_i.shape[0]
    n = 2 * b
    z = jnp.concatenate([z_i, z_j], axis=0).astype(jnp.float32)
    zn = z / jnp.maximum(jnp.linalg.norm(z, axis=-1, keepdims=True), _EPS)
    sim = (zn @ zn.T) / temperature
    pos = jnp.concatenate([jnp.diag(sim, b), jnp.diag(sim, -b)])
    sim_nd = jnp.where(jnp.eye(n, dtype=bool), -jnp.inf, sim)
    lse = jax.scipy.special.logsumexp(sim_nd, axis=-1)
    return jnp.sum(lse - pos) / n


if __name__ == "__main__":
    key = jax.random.PRNGKey(0)
    k1, k2 = jax.random.split(key)
    batch_size, hidden = 16, 32
    z_i = jax.random.normal(k1, (batch_size, hidden), dtype=jnp.float32)
    z_j = jax.random.normal(k2, (batch_size, hidden), dtype=jnp.float32)

    ref = _reference_loss(z_i, z_j, temperature=0.5)

    # Multi-col-tile path: grid = (2, 2); exercises the online-logsumexp update
    # and the per-tile diagonal masking across tile boundaries.
    loss_tiled = nt_xent_loss(z_i, z_j, temperature=0.5, block_q=8, block_k=8)
    jax.block_until_ready(loss_tiled)

    # Auto-picked blocks (single col tile at this tiny batch), plus an f32 MXU path.
    loss_auto = nt_xent_loss(z_i, z_j, temperature=0.5)
    loss_f32 = nt_xent_loss(z_i, z_j, temperature=0.5, matmul_dtype=jnp.float32)
    jax.block_until_ready((loss_auto, loss_f32))

    # Tolerances absorb bf16 MXU operands (with f32 accumulation) vs the f32 reference.
    assert jnp.allclose(loss_tiled, ref, rtol=1e-2, atol=1e-2), (loss_tiled, ref)
    assert jnp.allclose(loss_auto, ref, rtol=1e-2, atol=1e-2), (loss_auto, ref)
    assert jnp.allclose(loss_f32, ref, rtol=1e-2, atol=1e-2), (loss_f32, ref)
    print("KERNEL_OK")
</pallas_src>

<mosaic_0001>
module attributes {stable_mosaic.version = 11 : i64} {
  func.func @_nt_xent_kernel(%arg0: i32, %arg1: i32, %arg2: memref<8x32xbf16, #tpu.memory_space<vmem>>, %arg3: memref<8x32xbf16, #tpu.memory_space<vmem>>, %arg4: memref<8x32xbf16, #tpu.memory_space<vmem>>, %arg5: memref<8x32xbf16, #tpu.memory_space<vmem>>, %arg6: memref<2x8x1xf32, #tpu.memory_space<vmem>>, %arg7: memref<8x128xf32, #tpu.memory_space<vmem>>, %arg8: memref<8x128xf32, #tpu.memory_space<vmem>>, %arg9: memref<8x128xf32, #tpu.memory_space<vmem>>, %arg10: memref<8x128xf32, #tpu.memory_space<vmem>>) attributes {dimension_semantics = [#tpu.dimension_semantics<parallel>, #tpu.dimension_semantics<arbitrary>], iteration_bounds = array<i64: 2, 2>, scalar_prefetch = 0 : i64, scratch_operands = 4 : i64, tpu.core_type = #tpu.core_type<tc>, window_params = [{transform_indices = @transform_0, window_bounds = array<i64: 8, 32>}, {transform_indices = @transform_1, window_bounds = array<i64: 8, 32>}, {transform_indices = @transform_2, window_bounds = array<i64: 8, 32>}, {transform_indices = @transform_3, window_bounds = array<i64: 8, 32>}, {transform_indices = @transform_4, window_bounds = array<i64: 2, 8, 1>}]} {
    %c0_i32 = arith.constant 0 : i32
    %0 = arith.cmpi eq, %arg1, %c0_i32 : i32
    %1 = arith.extui %0 : i1 to i32
    %c0_i32_0 = arith.constant 0 : i32
    %2 = arith.cmpi ne, %1, %c0_i32_0 : i32
    scf.if %2 {
      %cst_47 = arith.constant 0xFF800000 : f32
      %87 = vector.broadcast %cst_47 : f32 to vector<8x128xf32>
      %c0_48 = arith.constant 0 : index
      %c0_49 = arith.constant 0 : index
      %88 = vector.load %arg7[%c0_48, %c0_49] : memref<8x128xf32, #tpu.memory_space<vmem>>, vector<8x128xf32>
      tpu.vector_store %arg7[%c0_48, %c0_49], %87 {strides = array<i32>} : memref<8x128xf32, #tpu.memory_space<vmem>>, vector<8x128xf32>,
      %cst_50 = arith.constant 0xFF800000 : f32
      %89 = vector.broadcast %cst_50 : f32 to vector<8x128xf32>
      %c0_51 = arith.constant 0 : index
      %c0_52 = arith.constant 0 : index
      %90 = vector.load %arg9[%c0_51, %c0_52] : memref<8x128xf32, #tpu.memory_space<vmem>>, vector<8x128xf32>
      tpu.vector_store %arg9[%c0_51, %c0_52], %89 {strides = array<i32>} : memref<8x128xf32, #tpu.memory_space<vmem>>, vector<8x128xf32>,
      %cst_53 = arith.constant 0.000000e+00 : f32
      %91 = vector.broadcast %cst_53 : f32 to vector<8x128xf32>
      %c0_54 = arith.constant 0 : index
      %c0_55 = arith.constant 0 : index
      %92 = vector.load %arg8[%c0_54, %c0_55] : memref<8x128xf32, #tpu.memory_space<vmem>>, vector<8x128xf32>
      tpu.vector_store %arg8[%c0_54, %c0_55], %91 {strides = array<i32>} : memref<8x128xf32, #tpu.memory_space<vmem>>, vector<8x128xf32>,
      %cst_56 = arith.constant 0.000000e+00 : f32
      %93 = vector.broadcast %cst_56 : f32 to vector<8x128xf32>
      %c0_57 = arith.constant 0 : index
      %c0_58 = arith.constant 0 : index
      %94 = vector.load %arg10[%c0_57, %c0_58] : memref<8x128xf32, #tpu.memory_space<vmem>>, vector<8x128xf32>
      tpu.vector_store %arg10[%c0_57, %c0_58], %93 {strides = array<i32>} : memref<8x128xf32, #tpu.memory_space<vmem>>, vector<8x128xf32>,
    } else {
    }
    %c8_i32 = arith.constant 8 : i32
    %3 = arith.muli %arg0, %c8_i32 : i32
    %4 = tpu.iota {dimensions = array<i32: 0>} : vector<8x8xi32>
    %5 = vector.broadcast %3 : i32 to vector<8x8xi32>
    %6 = arith.addi %5, %4 : vector<8x8xi32>
    %c8_i32_1 = arith.constant 8 : i32
    %7 = arith.muli %arg1, %c8_i32_1 : i32
    %8 = tpu.iota {dimensions = array<i32: 1>} : vector<8x8xi32>
    %9 = vector.broadcast %7 : i32 to vector<8x8xi32>
    %10 = arith.addi %9, %8 : vector<8x8xi32>
    %11 = arith.cmpi eq, %6, %10 : vector<8x8xi32>
    %c0 = arith.constant 0 : index
    %c0_2 = arith.constant 0 : index
    %12 = vector.load %arg2[%c0, %c0_2] : memref<8x32xbf16, #tpu.memory_space<vmem>>, vector<8x32xbf16>
    %c0_3 = arith.constant 0 : index
    %c0_4 = arith.constant 0 : index
    %13 = vector.load %arg4[%c0_3, %c0_4] : memref<8x32xbf16, #tpu.memory_space<vmem>>, vector<8x32xbf16>
    %cst = arith.constant dense<0.000000e+00> : vector<8x8xf32>
    %14 = tpu.matmul %12, %13, %cst {dimension_numbers = #tpu.dot_dimension_numbers<[1], [1], [0], [0], [0, 0, 1, 0], [], []>} : vector<8x32xbf16>, vector<8x32xbf16>, vector<8x8xf32> -> vector<8x8xf32>
    %cst_5 = arith.constant 2.000000e+00 : f32
    %15 = vector.broadcast %cst_5 : f32 to vector<8x8xf32>
    %16 = arith.mulf %14, %15 : vector<8x8xf32>
    %cst_6 = arith.constant -1.000000e+30 : f32
    %17 = vector.broadcast %cst_6 : f32 to vector<8x8xf32>
    %18 = arith.select %11, %17, %16 : vector<8x8xi1>, vector<8x8xf32>
    %c0_7 = arith.constant 0 : index
    %c0_8 = arith.constant 0 : index
    %19 = vector.load %arg2[%c0_7, %c0_8] : memref<8x32xbf16, #tpu.memory_space<vmem>>, vector<8x32xbf16>
    %c0_9 = arith.constant 0 : index
    %c0_10 = arith.constant 0 : index
    %20 = vector.load %arg5[%c0_9, %c0_10] : memref<8x32xbf16, #tpu.memory_space<vmem>>, vector<8x32xbf16>
    %cst_11 = arith.constant dense<0.000000e+00> : vector<8x8xf32>
    %21 = tpu.matmul %19, %20, %cst_11 {dimension_numbers = #tpu.dot_dimension_numbers<[1], [1], [0], [0], [0, 0, 1, 0], [], []>} : vector<8x32xbf16>, vector<8x32xbf16>, vector<8x8xf32> -> vector<8x8xf32>
    %cst_12 = arith.constant 2.000000e+00 : f32
    %22 = vector.broadcast %cst_12 : f32 to vector<8x8xf32>
    %23 = arith.mulf %21, %22 : vector<8x8xf32>
    %24 = arith.maximumf %18, %23 : vector<8x8xf32>
    %cst_13 = arith.constant dense<0xFF800000> : vector<8xf32>
    %25 = vector.multi_reduction <maximumf>, %24, %cst_13 [1] : vector<8x8xf32> to vector<8xf32>
    %26 = vector.shape_cast %25 : vector<8xf32> to vector<8x1xf32>
    %c0_14 = arith.constant 0 : index
    %c0_15 = arith.constant 0 : index
    %27 = vector.load %arg7[%c0_14, %c0_15] : memref<8x128xf32, #tpu.memory_space<vmem>>, vector<8x128xf32>
    %28 = vector.broadcast %26 : vector<8x1xf32> to vector<8x128xf32>
    %29 = arith.maximumf %27, %28 : vector<8x128xf32>
    %30 = vector.extract_strided_slice %29 {offsets = [0, 0], sizes = [8, 1], strides = [1, 1]} : vector<8x128xf32> to vector<8x1xf32>
    %31 = vector.broadcast %30 : vector<8x1xf32> to vector<8x8xf32>
    %32 = arith.subf %18, %31 : vector<8x8xf32>
    %33 = math.exp %32 : vector<8x8xf32>
    %34 = vector.broadcast %30 : vector<8x1xf32> to vector<8x8xf32>
    %35 = arith.subf %23, %34 : vector<8x8xf32>
    %36 = math.exp %35 : vector<8x8xf32>
    %37 = arith.addf %33, %36 : vector<8x8xf32>
    %c0_16 = arith.constant 0 : index
    %c0_17 = arith.constant 0 : index
    %38 = vector.load %arg8[%c0_16, %c0_17] : memref<8x128xf32, #tpu.memory_space<vmem>>, vector<8x128xf32>
    %39 = arith.subf %27, %29 : vector<8x128xf32>
    %40 = math.exp %39 : vector<8x128xf32>
    %41 = arith.mulf %38, %40 : vector<8x128xf32>
    %cst_18 = arith.constant dense<0.000000e+00> : vector<8xf32>
    %42 = vector.multi_reduction <add>, %37, %cst_18 [1] : vector<8x8xf32> to vector<8xf32>
    %43 = vector.shape_cast %42 : vector<8xf32> to vector<8x1xf32>
    %44 = vector.broadcast %43 : vector<8x1xf32> to vector<8x128xf32>
    %45 = arith.addf %41, %44 : vector<8x128xf32>
    %c0_19 = arith.constant 0 : index
    %c0_20 = arith.constant 0 : index
    %46 = vector.load %arg8[%c0_19, %c0_20] : memref<8x128xf32, #tpu.memory_space<vmem>>, vector<8x128xf32>
    tpu.vector_store %arg8[%c0_19, %c0_20], %45 {strides = array<i32>} : memref<8x128xf32, #tpu.memory_space<vmem>>, vector<8x128xf32>,
    %c0_21 = arith.constant 0 : index
    %c0_22 = arith.constant 0 : index
    %47 = vector.load %arg7[%c0_21, %c0_22] : memref<8x128xf32, #tpu.memory_space<vmem>>, vector<8x128xf32>
    tpu.vector_store %arg7[%c0_21, %c0_22], %29 {strides = array<i32>} : memref<8x128xf32, #tpu.memory_space<vmem>>, vector<8x128xf32>,
    %c0_23 = arith.constant 0 : index
    %c0_24 = arith.constant 0 : index
    %48 = vector.load %arg3[%c0_23, %c0_24] : memref<8x32xbf16, #tpu.memory_space<vmem>>, vector<8x32xbf16>
    %c0_25 = arith.constant 0 : index
    %c0_26 = arith.constant 0 : index
    %49 = vector.load %arg4[%c0_25, %c0_26] : memref<8x32xbf16, #tpu.memory_space<vmem>>, vector<8x32xbf16>
    %cst_27 = arith.constant dense<0.000000e+00> : vector<8x8xf32>
    %50 = tpu.matmul %48, %49, %cst_27 {dimension_numbers = #tpu.dot_dimension_numbers<[1], [1], [0], [0], [0, 0, 1, 0], [], []>} : vector<8x32xbf16>, vector<8x32xbf16>, vector<8x8xf32> -> vector<8x8xf32>
    %cst_28 = arith.constant 2.000000e+00 : f32
    %51 = vector.broadcast %cst_28 : f32 to vector<8x8xf32>
    %52 = arith.mulf %50, %51 : vector<8x8xf32>
    %c0_29 = arith.constant 0 : index
    %c0_30 = arith.constant 0 : index
    %53 = vector.load %arg3[%c0_29, %c0_30] : memref<8x32xbf16, #tpu.memory_space<vmem>>, vector<8x32xbf16>
    %c0_31 = arith.constant 0 : index
    %c0_32 = arith.constant 0 : index
    %54 = vector.load %arg5[%c0_31, %c0_32] : memref<8x32xbf16, #tpu.memory_space<vmem>>, vector<8x32xbf16>
    %cst_33 = arith.constant dense<0.000000e+00> : vector<8x8xf32>
    %55 = tpu.matmul %53, %54, %cst_33 {dimension_numbers = #tpu.dot_dimension_numbers<[1], [1], [0], [0], [0, 0, 1, 0], [], []>} : vector<8x32xbf16>, vector<8x32xbf16>, vector<8x8xf32> -> vector<8x8xf32>
    %cst_34 = arith.constant 2.000000e+00 : f32
    %56 = vector.broadcast %cst_34 : f32 to vector<8x8xf32>
    %57 = arith.mulf %55, %56 : vector<8x8xf32>
    %cst_35 = arith.constant -1.000000e+30 : f32
    %58 = vector.broadcast %cst_35 : f32 to vector<8x8xf32>
    %59 = arith.select %11, %58, %57 : vector<8x8xi1>, vector<8x8xf32>
    %60 = arith.maximumf %52, %59 : vector<8x8xf32>
    %cst_36 = arith.constant dense<0xFF800000> : vector<8xf32>
    %61 = vector.multi_reduction <maximumf>, %60, %cst_36 [1] : vector<8x8xf32> to vector<8xf32>
    %62 = vector.shape_cast %61 : vector<8xf32> to vector<8x1xf32>
    %c0_37 = arith.constant 0 : index
    %c0_38 = arith.constant 0 : index
    %63 = vector.load %arg9[%c0_37, %c0_38] : memref<8x128xf32, #tpu.memory_space<vmem>>, vector<8x128xf32>
    %64 = vector.broadcast %62 : vector<8x1xf32> to vector<8x128xf32>
    %65 = arith.maximumf %63, %64 : vector<8x128xf32>
    %66 = vector.extract_strided_slice %65 {offsets = [0, 0], sizes = [8, 1], strides = [1, 1]} : vector<8x128xf32> to vector<8x1xf32>
    %67 = vector.broadcast %66 : vector<8x1xf32> to vector<8x8xf32>
    %68 = arith.subf %52, %67 : vector<8x8xf32>
    %69 = math.exp %68 : vector<8x8xf32>
    %70 = vector.broadcast %66 : vector<8x1xf32> to vector<8x8xf32>
    %71 = arith.subf %59, %70 : vector<8x8xf32>
    %72 = math.exp %71 : vector<8x8xf32>
    %73 = arith.addf %69, %72 : vector<8x8xf32>
    %c0_39 = arith.constant 0 : index
    %c0_40 = arith.constant 0 : index
    %74 = vector.load %arg10[%c0_39, %c0_40] : memref<8x128xf32, #tpu.memory_space<vmem>>, vector<8x128xf32>
    %75 = arith.subf %63, %65 : vector<8x128xf32>
    %76 = math.exp %75 : vector<8x128xf32>
    %77 = arith.mulf %74, %76 : vector<8x128xf32>
    %cst_41 = arith.constant dense<0.000000e+00> : vector<8xf32>
    %78 = vector.multi_reduction <add>, %73, %cst_41 [1] : vector<8x8xf32> to vector<8xf32>
    %79 = vector.shape_cast %78 : vector<8xf32> to vector<8x1xf32>
    %80 = vector.broadcast %79 : vector<8x1xf32> to vector<8x128xf32>
    %81 = arith.addf %77, %80 : vector<8x128xf32>
    %c0_42 = arith.constant 0 : index
    %c0_43 = arith.constant 0 : index
    %82 = vector.load %arg10[%c0_42, %c0_43] : memref<8x128xf32, #tpu.memory_space<vmem>>, vector<8x128xf32>
    tpu.vector_store %arg10[%c0_42, %c0_43], %81 {strides = array<i32>} : memref<8x128xf32, #tpu.memory_space<vmem>>, vector<8x128xf32>,
    %c0_44 = arith.constant 0 : index
    %c0_45 = arith.constant 0 : index
    %83 = vector.load %arg9[%c0_44, %c0_45] : memref<8x128xf32, #tpu.memory_space<vmem>>, vector<8x128xf32>
    tpu.vector_store %arg9[%c0_44, %c0_45], %65 {strides = array<i32>} : memref<8x128xf32, #tpu.memory_space<vmem>>, vector<8x128xf32>,
    %c1_i32 = arith.constant 1 : i32
    %84 = arith.cmpi eq, %arg1, %c1_i32 : i32
    %85 = arith.extui %84 : i1 to i32
    %c0_i32_46 = arith.constant 0 : i32
    %86 = arith.cmpi ne, %85, %c0_i32_46 : i32
    scf.if %86 {
      %c0_47 = arith.constant 0 : index
      %c0_48 = arith.constant 0 : index
      %87 = vector.load %arg2[%c0_47, %c0_48] : memref<8x32xbf16, #tpu.memory_space<vmem>>, vector<8x32xbf16>
      %88 = arith.extf %87 : vector<8x32xbf16> to vector<8x32xf32>
      %c0_49 = arith.constant 0 : index
      %c0_50 = arith.constant 0 : index
      %89 = vector.load %arg3[%c0_49, %c0_50] : memref<8x32xbf16, #tpu.memory_space<vmem>>, vector<8x32xbf16>
      %90 = arith.extf %89 : vector<8x32xbf16> to vector<8x32xf32>
      %91 = arith.mulf %88, %90 : vector<8x32xf32>
      %cst_51 = arith.constant dense<0.000000e+00> : vector<8xf32>
      %92 = vector.multi_reduction <add>, %91, %cst_51 [1] : vector<8x32xf32> to vector<8xf32>
      %93 = vector.shape_cast %92 : vector<8xf32> to vector<8x1xf32>
      %cst_52 = arith.constant 2.000000e+00 : f32
      %94 = vector.broadcast %cst_52 : f32 to vector<8x1xf32>
      %95 = arith.mulf %94, %93 : vector<8x1xf32>
      %c0_53 = arith.constant 0 : index
      %c0_54 = arith.constant 0 : index
      %96 = vector.load %arg7[%c0_53, %c0_54] : memref<8x128xf32, #tpu.memory_space<vmem>>, vector<8x1xf32>
      %c0_55 = arith.constant 0 : index
      %c0_56 = arith.constant 0 : index
      %97 = vector.load %arg8[%c0_55, %c0_56] : memref<8x128xf32, #tpu.memory_space<vmem>>, vector<8x1xf32>
      %98 = math.log %97 : vector<8x1xf32>
      %99 = arith.addf %96, %98 : vector<8x1xf32>
      %c0_57 = arith.constant 0 : index
      %c0_58 = arith.constant 0 : index
      %100 = vector.load %arg9[%c0_57, %c0_58] : memref<8x128xf32, #tpu.memory_space<vmem>>, vector<8x1xf32>
      %c0_59 = arith.constant 0 : index
      %c0_60 = arith.constant 0 : index
      %101 = vector.load %arg10[%c0_59, %c0_60] : memref<8x128xf32, #tpu.memory_space<vmem>>, vector<8x1xf32>
      %102 = math.log %101 : vector<8x1xf32>
      %103 = arith.addf %100, %102 : vector<8x1xf32>
      %104 = arith.subf %99, %95 : vector<8x1xf32>
      %c0_61 = arith.constant 0 : index
      %c0_62 = arith.constant 0 : index
      %c0_63 = arith.constant 0 : index
      %105 = vector.load %arg6[%c0_61, %c0_62, %c0_63] : memref<2x8x1xf32, #tpu.memory_space<vmem>>, vector<1x8x1xf32>
      %106 = vector.shape_cast %105 : vector<1x8x1xf32> to vector<8x1xf32>
      %107 = vector.shape_cast %104 : vector<8x1xf32> to vector<1x8x1xf32>
      tpu.vector_store %arg6[%c0_61, %c0_62, %c0_63], %107 {strides = array<i32>} : memref<2x8x1xf32, #tpu.memory_space<vmem>>, vector<1x8x1xf32>,
      %108 = arith.subf %103, %95 : vector<8x1xf32>
      %c1 = arith.constant 1 : index
      %c0_64 = arith.constant 0 : index
      %c0_65 = arith.constant 0 : index
      %109 = vector.load %arg6[%c1, %c0_64, %c0_65] : memref<2x8x1xf32, #tpu.memory_space<vmem>>, vector<1x8x1xf32>
      %110 = vector.shape_cast %109 : vector<1x8x1xf32> to vector<8x1xf32>
      %111 = vector.shape_cast %108 : vector<8x1xf32> to vector<1x8x1xf32>
      tpu.vector_store %arg6[%c1, %c0_64, %c0_65], %111 {strides = array<i32>} : memref<2x8x1xf32, #tpu.memory_space<vmem>>, vector<1x8x1xf32>,
    } else {
    }
    return
  }
  func.func @transform_0(%arg0: i32, %arg1: i32) -> (i32, i32) {
    %c0_i32 = arith.constant 0 : i32
    %c0_i32_0 = arith.constant 0 : i32
    return %arg0, %c0_i32 : i32, i32
  }
  func.func @transform_1(%arg0: i32, %arg1: i32) -> (i32, i32) {
    %c0_i32 = arith.constant 0 : i32
    %c0_i32_0 = arith.constant 0 : i32
    return %arg0, %c0_i32 : i32, i32
  }
  func.func @transform_2(%arg0: i32, %arg1: i32) -> (i32, i32) {
    %c0_i32 = arith.constant 0 : i32
    %c0_i32_0 = arith.constant 0 : i32
    return %arg1, %c0_i32 : i32, i32
  }
  func.func @transform_3(%arg0: i32, %arg1: i32) -> (i32, i32) {
    %c0_i32 = arith.constant 0 : i32
    %c0_i32_0 = arith.constant 0 : i32
    return %arg1, %c0_i32 : i32, i32
  }
  func.func @transform_4(%arg0: i32, %arg1: i32) -> (i32, i32, i32) {
    %c0_i32 = arith.constant 0 : i32
    %c0_i32_0 = arith.constant 0 : i32
    %c0_i32_1 = arith.constant 0 : i32
    return %c0_i32, %arg0, %c0_i32_0 : i32, i32, i32
  }
}

</mosaic_0001>

<bundles_post_ra>
// kernel: tpu_custom_call.1
= control target key start
LH: loop header
LB: loop body
LE: loop exit
PB: predicated region body
PF: predicated region fallthrough
CT: control target
= control target key end

     0   :  { %s1544_s0 = inlined_call_operand.hbm [shape: bf16[16,32], index: 0, kind: input, shape index: {}]   ;;  %s1545_s1 = inlined_call_operand.hbm [shape: bf16[16,32], index: 1, kind: input, shape index: {}]   ;;  %s1546_s2 = inlined_call_operand.hbm [shape: bf16[16,32], index: 2, kind: input, shape index: {}]   ;;  %s1547_s3 = inlined_call_operand.vmem [shape: bf16[16,32], index: 3, kind: input, shape index: {}]   ;;  %s1548_s4 = inlined_call_operand.vmem [shape: f32[2,16,1], index: 4, kind: output, shape index: {}]  }
   0x1   :  { %1555 = sst [smem:[#allocation16_spill]] %s1544_s0 }
   0x2   :  { %1556 = sst [smem:[#allocation17_spill]] %s1545_s1 }
   0x3   :  { %1557 = sst [smem:[#allocation18_spill]] %s1548_s4 }
   0x4   :  { %9 = vsyncpa [#allocation7], 0 }
   0x5   :  { %11 = vsyncpa [#allocation7 + $0x1], 0 }
   0x6   :  { %12 = vsyncpa [#allocation9], 0 }
   0x7   :  { %14 = vsyncpa [#allocation9 + $0x1], 0  ;;  %s1193_s15 = smov 0   ;;  %s1195_s16 = smov 0  }
   0x8   :  { %s1197_s17 = smov 0   ;;  %s1199_s18 = smov 0  }
   0x9   :  { %s1201_s19 = smov 0   ;;  %s1203_s20 = smov 0  }
   0xa   :  { %s1205_s21 = smov 0   ;;  %s1207_s22 = smov 0  }
   0xb   :  { %s1209_s23 = smov 0   ;;  %s1211_s24 = smov 0  }
   0xc   :  { %s1213_s25 = smov 0  }
   0xd LB: > { %s1247_s26 = sadd.s32 4294967295, %s1158_s25   ;;  %p46_p0 = scmp.ne.s32.totalorder %s1138_s20, %s1134_s19  ;;  %s1158_s25 = sphi %s1213_s25, %s20_s25   ;;  %s1154_s24 = sphi %s1211_s24, %s1590_s24   ;;  %s1150_s23 = sphi %s1209_s23, %s1589_s23   ;;  %s1146_s22 = sphi %s1207_s22, %s1588_s22   ;;  %s1142_s21 = sphi %s1205_s21, %s1587_s21   ;;  %s1138_s20 = sphi %s1203_s20, %s1586_s20   ;;  %s1134_s19 = sphi %s1201_s19, %s1585_s19   ;;  %s1130_s18 = sphi %s1199_s18, %s1584_s18   ;;  %s1126_s17 = sphi %s1197_s17, %s1583_s17   ;;  %s1122_s16 = sphi %s1195_s16, %s1582_s16   ;;  %s1118_s15 = sphi %s1193_s15, %s1581_s15  }
   0xe   : > { %p1552_p1 = scmp.eq.s32.totalorder %s1158_s25, 0  ;;  %p52_p2 = scmp.ne.s32.totalorder %s1134_s19, %s1130_s18 }
   0xf   : > { %p1551_p3 = scmp.eq.s32.totalorder %s1247_s26, 0  ;;  %p154_p4 = scmp.eq.s32.totalorder %s1247_s26, 3 }
  0x10   : > { %p48_p5 = por %p1552_p1, %p46_p0  ;;  %p1550_p8 = scmp.lt.s32.totalorder %s1158_s25, 4 }
  0x11   : > { %p1261_p6 = por %p1551_p3, %p52_p2  ;;  %p1265_p7 = por %p154_p4, %p46_p0 }
  0x12   : > { %s1549_s5 = sand.u32 1, %s1138_s20   ;;  %s786_s7 = sshll.u32 %s1154_s24, 6 }
  0x13   : > { %s1558_s29 = scalar_select %p1261_p6, 1, 0 }
  0x14   : > { %s1559_s30 = scalar_select %p1265_p7, 1, 0 }
  0x15   : > { %s1273_s6 = sshll.u32 %s1549_s5, 2  ;;  %p1278_p9 = pnand %p1550_p8, %p48_p5 }
  0x16   : > { %s198_s9 = sand.u32 1, %s1158_s25   ;;  %s1561_s1 = sld [smem:[#allocation17_spill]] }
  0x17   : > { %s202_s13 = scalar_lea.vmem [#allocation8], %s1273_s6  ;;  %s1295_s18 = scalar_lea.sflag [#allocation9], %s198_s9 }
  0x18   : > { %s209_s14 = sshll.u32 %s202_s13, 4  ;;  %p972_p13 = pneg %p1278_p9  ;;  %s1292_s14 = int_to_ptr.vmem [resolvable:$true] %s209_s14 }
  0x1c   : > { %s1288_s12 = scalar_lea.hbm %s1561_s1, %s786_s7  ;;  %s975_s27 = scalar_lea.hbm %s1561_s1, 128 }
  0x1d   : > { %s970_s28 = scalar_lea.hbm %s1288_s12, 64  ;;  %p976_p4 = scmp.lt.u32.totalorder %s1288_s12, %s1561_s1 }
  0x1e   : > { %p971_p12 = scmp.ne.s32.totalorder %s1288_s12, %s970_s28  ;;  %p977_p5 = scmp.lt.u32.totalorder %s975_s27, %s970_s28 }
  0x1f   : > { %p979_p3 = scmp.lt.u32.totalorder %s970_s28, %s1288_s12 }
  0x20   : > { %p973_p0 = pnand %p972_p13, %p971_p12  ;;  %p978_p8 = por %p977_p5, %p976_p4 }
  0x22   : > { %p974_p2 = pneg %p973_p0  ;;  %p980_p1 = por %p979_p3, %p978_p8 }
  0x24   : > { %p981_p10 = pnand %p980_p1, %p974_p2 }
  0x26   : > { %984 = shalt.err (!%p981_p10)
}
  0x27   : > { %s985_s9 = scalar_lea.vmem %s1292_s14, 64  ;;  %s1160_s10 = smov [#allocation8]  }
  0x28   : > { %p986_p12 = scmp.ne.s32.totalorder %s1292_s14, %s985_s9  ;;  %s990_s11 = sshll.u32 %s1160_s10, 4  ;;  %s991_s11 = int_to_ptr.vmem [resolvable:$false] %s990_s11 }
  0x29   : > { %s992_s5 = scalar_lea.vmem %s991_s11, 128  ;;  %p993_p7 = scmp.lt.s32.totalorder %s1292_s14, %s991_s11 }
  0x2a   : > { %p988_p0 = pnand %p986_p12, %p972_p13  ;;  %p994_p4 = scmp.lt.s32.totalorder %s992_s5, %s985_s9 }
  0x2c   : > { %p989_p11 = pneg %p988_p0  ;;  %p995_p5 = por %p994_p4, %p993_p7 }
  0x2e   : > { %p996_p3 = pnand %p995_p5, %p989_p11 }
  0x30   : > { %999 = shalt.err (!%p996_p3)
}
  0x31   : > { %854 = dma.hbm_to_vmem [thread:$0]  (!%p1278_p9), %s1288_s12, 64, %s1292_s14, %s1295_s18  }
  0x32   : > { %p1562_p1 = scmp.lt.s32.totalorder %s1158_s25, 5  ;;  %p1563_p8 = scmp.ge.s32.totalorder %s1158_s25, 1 }
  0x33   : > { %s1565_s0 = sld [smem:[#allocation16_spill]]  ;;  %s184_s10 = scalar_lea.vmem [#allocation6], %s1273_s6 }
  0x34   : > { %p1327_p10 = pnand %p1563_p8, %p1562_p1  ;;  %s191_s11 = sshll.u32 %s184_s10, 4  ;;  %s192_s11 = int_to_ptr.vmem [resolvable:$true] %s191_s11 }
  0x35   : > { %s1566_s12 = sand.u32 1, %s1138_s20  }
  0x36   : > { %s1564_s27 = scalar_select %p1327_p10, 1, 0 }
  0x37   : > { %s181_s14 = scalar_lea.sflag [#allocation7], %s1566_s12 }
  0x39   : > { %s1336_s9 = scalar_lea.hbm %s1565_s0, %s786_s7  ;;  %s1005_s7 = scalar_lea.hbm %s1565_s0, 128 }
  0x3a   : > { %s1000_s5 = scalar_lea.hbm %s1336_s9, 64  ;;  %p1006_p12 = scmp.lt.u32.totalorder %s1336_s9, %s1565_s0 }
  0x3b   : > { %p1001_p7 = scmp.ne.s32.totalorder %s1336_s9, %s1000_s5  ;;  %p1007_p0 = scmp.lt.u32.totalorder %s1005_s7, %s1000_s5 }
  0x3c   : > { %p1009_p5 = scmp.lt.u32.totalorder %s1000_s5, %s1336_s9 }
  0x3d   : > { %p1003_p11 = pnand %p1001_p7, %p972_p13  ;;  %p1008_p4 = por %p1007_p0, %p1006_p12 }
  0x3f   : > { %p1004_p2 = pneg %p1003_p11  ;;  %p1010_p3 = por %p1009_p5, %p1008_p4 }
  0x41   : > { %p1011_p1 = pnand %p1010_p3, %p1004_p2 }
  0x43   : > { %1014 = shalt.err (!%p1011_p1)
}
  0x44   : > { %s1015_s6 = scalar_lea.vmem %s192_s11, 64  ;;  %s1161_s10 = smov [#allocation6]  }
  0x45   : > { %p1016_p8 = scmp.ne.s32.totalorder %s192_s11, %s1015_s6  ;;  %s1020_s1 = sshll.u32 %s1161_s10, 4  ;;  %s1021_s1 = int_to_ptr.vmem [resolvable:$false] %s1020_s1 }
  0x46   : > { %s1022_s4 = scalar_lea.vmem %s1021_s1, 128  ;;  %p1023_p6 = scmp.lt.s32.totalorder %s192_s11, %s1021_s1 }
  0x47   : > { %p1018_p7 = pnand %p1016_p8, %p972_p13  ;;  %p1024_p10 = scmp.lt.s32.totalorder %s1022_s4, %s1015_s6 }
  0x49   : > { %p1019_p11 = pneg %p1018_p7  ;;  %p1025_p0 = por %p1024_p10, %p1023_p6 }
  0x4b   : > { %p1026_p12 = pnand %p1025_p0, %p1019_p11 }
  0x4d   : > { %1029 = shalt.err (!%p1026_p12)
}
  0x4e   : > { %851 = dma.hbm_to_vmem [thread:$0]  (!%p1278_p9), %s1336_s9, 64, %s192_s11, %s181_s14  }
  0x4f   : > { %s29_s12 = sadd.s32 1, %s1150_s23  ;;  %s91_s5 = sadd.s32 1, %s1126_s17 }
  0x50   : > { %p30_p6 = scmp.ge.s32.totalorder %s29_s12, 2  ;;  %p98_p13 = scmp.ne.s32.totalorder %s1126_s17, %s1122_s16 }
  0x51   : > { %p104_p10 = scmp.ne.s32.totalorder %s1122_s16, %s1118_s15  ;;  %s218_s8 = sand.u32 1, %s1126_s17  }
  0x52   : > { %s1592_s12 = smov (%p30_p6, %s29_s12), 0  ;;  %s1568_s7 = sadd.s32 1, %s1154_s24 }
  0x53   : > { %1567 = sst [smem:[#allocation15_spill]] %s1592_s12  ;;  %s1594_s7 = smov (!%p30_p6, %s1568_s7), %s1154_s24 }
  0x54   : > { %s88_s28 = ssub.s32 %s1150_s23, %s1592_s12  ;;  %p1569_p2 = scmp.eq.s32.totalorder %s1158_s25, 0 }
  0x55   : > { %p34_p4 = scmp.ge.s32.totalorder %s1594_s7, 2  ;;  %p89_p5 = scmp.eq.s32.totalorder %s88_s28, 0 }
  0x56   : > { %p1376_p9 = por %p98_p13, %p1569_p2  ;;  %p1571_p3 = scmp.eq.s32.totalorder %s1247_s26, 0 }
  0x57   : > { %s789_s11 = sshll.u32 %s218_s8, 2  ;;  %s1596_s7 = smov (%p34_p4, %s1594_s7), 0 }
  0x58   : > { %p1382_p1 = por %p104_p10, %p1571_p3  ;;  %s36_s13 = ssub.s32 %s1154_s24, %s1596_s7 }
  0x59   : > { %s1389_s14 = scalar_select %p89_p5, %s1126_s17, %s91_s5  }
  0x5a   : > { %p37_p8 = scmp.eq.s32.totalorder %s36_s13, 0  ;;  %s790_s6 = sshll.u32 %s1150_s23, 6 }
  0x5b   : > { %s1397_s4 = scalar_lea.hbm %s1546_s2, %s790_s6  ;;  %s220_s28 = scalar_lea.vmem [#allocation10], %s789_s11 }
  0x5c   : > { %s227_s0 = sshll.u32 %s220_s28, 4  ;;  %s1573_s8 = sadd.s32 1, %s1138_s20  ;;  %s1404_s0 = int_to_ptr.vmem [resolvable:$true] %s227_s0 }
  0x5d   : > { %s1402_s12 = scalar_select %p37_p8, %s1138_s20, %s1573_s8  }
  0x5e   : > { %p1574_p7 = scmp.lt.s32.totalorder %s1158_s25, 4  ;;  %s1030_s13 = scalar_lea.hbm %s1397_s4, 64 }
  0x5f   : > { %p1031_p0 = scmp.ne.s32.totalorder %s1397_s4, %s1030_s13  ;;  %s1035_s10 = scalar_lea.hbm %s1546_s2, 128 }
  0x60   : > { %p1410_p11 = pnand %p1574_p7, %p1376_p9  ;;  %p1036_p10 = scmp.lt.u32.totalorder %s1397_s4, %s1546_s2 }
  0x61   : > { %p1037_p2 = scmp.lt.u32.totalorder %s1035_s10, %s1030_s13  ;;  %p1039_p4 = scmp.lt.u32.totalorder %s1030_s13, %s1397_s4 }
  0x62   : > { %p1032_p12 = pneg %p1410_p11 }
  0x63   : > { %p1038_p9 = por %p1037_p2, %p1036_p10 }
  0x64   : > { %p1033_p6 = pnand %p1032_p12, %p1031_p0 }
  0x65   : > { %p1040_p5 = por %p1039_p4, %p1038_p9 }
  0x66   : > { %p1034_p13 = pneg %p1033_p6 }
  0x68   : > { %p1041_p3 = pnand %p1040_p5, %p1034_p13 }
  0x6a   : > { %1044 = shalt.err (!%p1041_p3)
}
  0x6b   : > { %s1045_s28 = scalar_lea.vmem %s1404_s0, 64  ;;  %s1162_s8 = smov [#allocation10]  }
  0x6c   : > { %p1046_p8 = scmp.ne.s32.totalorder %s1404_s0, %s1045_s28  ;;  %s1050_s11 = sshll.u32 %s1162_s8, 4  ;;  %s1051_s11 = int_to_ptr.vmem [resolvable:$false] %s1050_s11 }
  0x6d   : > { %s1052_s6 = scalar_lea.vmem %s1051_s11, 128  ;;  %p1053_p6 = scmp.lt.s32.totalorder %s1404_s0, %s1051_s11 }
  0x6e   : > { %p1048_p7 = pnand %p1046_p8, %p1032_p12  ;;  %p1054_p10 = scmp.lt.s32.totalorder %s1052_s6, %s1045_s28 }
  0x70   : > { %p1049_p0 = pneg %p1048_p7  ;;  %p1055_p2 = por %p1054_p10, %p1053_p6 }
  0x72   : > { %p1056_p9 = pnand %p1055_p2, %p1049_p0 }
  0x74   : > { %1059 = shalt.err (!%p1056_p9)
}
  0x75   : > { %857 = dma.hbm_to_vmem [thread:$0]  (!%p1410_p11), %s1397_s4, 64, %s1404_s0, %s1295_s18  }
  0x76   : > { %p1576_p13 = scmp.ne.s32.totalorder %s1564_s27, 0 }
  0x77   : > { %s245_s13 = sand.u32 (!%p1576_p13), 1, %s1134_s19   ;;  %p1577_p12 = scmp.ne.s32.totalorder (!%p1576_p13), %s1558_s29, 0 }
  0x78   : > { %243 = sbr.rel (%p1576_p13) target bundleno = 850 (0x352), region = 36  ;;  %s792_s10 = sshll.u32 (!%p1576_p13), %s245_s13, 2 }
  0x79   : > { %s246_s9 = scalar_lea.sflag (!%p1576_p13), [#allocation7], %s245_s13  ;;  %s1443_s1 = scalar_lea.vmem (!%p1576_p13), [#allocation6], %s792_s10 }
  0x7f   : > { %1105 = dma.done.wait (%p1577_p12), %s246_s9, 64  }
  0x80   : > { %1107 = vsyncadd (%p1577_p12), %s246_s9, 4294967232  ;;  %s254_s5 = sand.u32 1, %s1247_s26   ;;  %s1450_s0 = scalar_lea.vmem [#allocation8], %s792_s10 }
  0x81   : > { %s255_s28 = scalar_lea.sflag [#allocation9], %s254_s5 }
  0x82   : > { %1109 = dma.done.wait (%p1577_p12), %s255_s28, 64  }
  0x83   : > { %1111 = vsyncadd (%p1577_p12), %s255_s28, 4294967232  ;;  %s265_s18 = sand.u32 1, %s1122_s16  }
  0x84   : > { %s1457_s27 = sshll.u32 %s265_s18, 2 }
  0x85   : > { %s267_s4 = scalar_lea.vmem [#allocation10], %s1457_s27 }
  0x86   : > { %1113 = dma.done.wait (%p1382_p1), %s255_s28, 64  }
  0x87   : > { %1115 = vsyncadd (%p1382_p1), %s255_s28, 4294967232  ;;  %s795_s26 = sshll.u32 %s245_s13, 4  ;;  %p305_p11 = scmp.lt.s32.totalorder %s1142_s21, 1 }
  0x88   : > { %s1469_s9 = scalar_lea.vmem [#allocation11], %s795_s26  ;;  %p797_p4 = scmp.ne.s32.totalorder %s1142_s21, 0 }
  0x89   : > { %s306_s8 = scalar_select %p305_p11, %s1142_s21, 1 }
  0x8a   : > { %313 = sbr.rel (%p797_p4) target bundleno = 145 (0x91), region = 52  ;;  %v1163_v0 = vmov (!%p797_p4), -inf   ;;  %v1164_v1 = vmov (!%p797_p4), 0.0  }
  0x8b   : > { %s796_s11 = sshll.u32 %s306_s8, 2  ;;  %314 = vst [vmem:[#allocation2] sm:$0xff] (!%p797_p4), %v1163_v0  ;;  %315 = vst [vmem:[#allocation4] sm:$0xff] (!%p797_p4), %v1163_v0 }
  0x8c   : > { %s308_s10 = scalar_lea.vmem %s1547_s3, %s796_s11  ;;  %316 = vst [vmem:[#allocation3] sm:$0xff] (!%p797_p4), %v1164_v1  ;;  %317 = vst [vmem:[#allocation5] sm:$0xff] (!%p797_p4), %v1164_v1 }
  0x91 PF: > { %v330_v2 = vld [vmem:[%s267_s4] sm:$0xf]  ;;  %vm331_vm0 = vcmask 261120   ;;  %v380_v3 = vld [vmem:[%s308_s10] sm:$0xf]  ;;  %v1165_v4 = vmov 0.0   ;;  %v319_v13 = vlaneseq }
  0x92   : > { %818 = vmatprep.subr.bf16.mxu0 %v1165_v4  ;;  %824 = vmatprep.subr.bf16.mxu1 %v1165_v4  ;;  %v336_v5 = vsel %vm331_vm0, %v330_v2, 0  ;;  %v382_v6 = vsel %vm331_vm0, %v380_v3, 0  ;;  %vm1166_vm1 = vmmov 0   ;;  %v456_v7 = vld [vmem:[%s267_s4] sm:$0xf]  ;;  %s798_s15 = sshll.u32 %s1146_s22, 3 }
  0x93   : > { %819 = vmatpush3.bf16.xpose.msra.mxu0 %v336_v5  ;;  %825 = vmatpush3.bf16.xpose.msra.mxu1 %v382_v6  ;;  %v504_v8 = vld [vmem:[%s308_s10] sm:$0xf]  ;;  %v461_v10 = vsel %vm331_vm0, %v456_v7, 0  ;;  %v455_v12 = vld [vmem:[%s1450_s0] sm:$0xf]  ;;  %s799_s13 = sshll.u32 %s1142_s21, 3  ;;  %v321_v16 = vstv %s798_s15 }
  0x94   : > { %820 = vmatprep.mubr.msk.bf16.mxu0 %vm1166_vm1, %v1165_v4  ;;  %826 = vmatprep.mubr.msk.bf16.mxu1 %vm1166_vm1, %v1165_v4  ;;  %v329_v9 = vld [vmem:[%s1443_s1] sm:$0xf]  ;;  %v506_v11 = vsel %vm331_vm0, %v504_v8, 0  ;;  %v320_v14 = vshrl.u32 %v319_v13, 7  ;;  %v325_v15 = vand.u32 127, %v319_v13  ;;  %v326_v17 = vstv %s799_s13  ;;  %v554_v51 = vld [vmem:[#allocation4] sm:$0xff] }
  0x95   : > { %830 = vmatprep.subr.bf16.mxu0 %v1165_v4  ;;  %836 = vmatprep.subr.bf16.mxu1 %v1165_v4  ;;  %vm426_vm3 = vcmask 64512   ;;  %v1167_v46 = vmov 0   ;;  %v430_v47 = vld [vmem:[#allocation2] sm:$0xff]  ;;  %p804_p1 = scmp.ne.s32.totalorder %s1142_s21, 1 }
  0x96   : > { %v322_v18 = vadd.s32 %v321_v16, %v320_v14  ;;  %v327_v19 = vadd.s32 %v326_v17, %v325_v15  ;;  %952 = vset.pattern.permute.xlu1 %v1167_v46  ;;  %953 = vset.pattern.permute.xlu0 %v1167_v46  ;;  %v568_v17 = vld [vmem:[#allocation5] sm:$0xff]  ;;  %vm603_vm4 = vcmask (!%p804_p1), 7168  }
  0x98   : > { %vm328_vm2 = vcmp.eq.s32.totalorder %v322_v18, %v327_v19 }
  0x9a   : > { %821 = vmatmul.mubr.msk.bf16.vlgmr.msra.gmra.mrb[0].mxu0 %vm331_vm0, %v329_v9  ;;  %827 = vmatmul.mubr.msk.bf16.vlgmr.msra.gmra.mrb[0].mxu1 %vm331_vm0, %v329_v9 }
  0x9b   : > { %831 = vmatpush3.bf16.xpose.msra.mxu0 %v461_v10  ;;  %837 = vmatpush3.bf16.xpose.msra.mxu1 %v506_v11 }
  0x9c   : > { %832 = vmatprep.mubr.msk.bf16.mxu0 %vm1166_vm1, %v1165_v4  ;;  %838 = vmatprep.mubr.msk.bf16.mxu1 %vm1166_vm1, %v1165_v4 }
  0xa2   : > { %833 = vmatmul.mubr.msk.bf16.vlgmr.msra.gmra.mrb[4].mxu0 %vm331_vm0, %v455_v12  ;;  %839 = vmatmul.mubr.msk.bf16.vlgmr.msra.gmra.mrb[4].mxu1 %vm331_vm0, %v455_v12  ;;  %v444_v12 = vld [vmem:[#allocation3] sm:$0xff] }
 0x16d   : > { %v372_v20 = vpop.f32.mrb[0].mxu0  ;;  %v418_v21 = vpop.f32.mrb[0].mxu1 }
 0x16e   : > { %v378_v22 = vmul.f32 2.0, %v372_v20  ;;  %v424_v23 = vmul.f32 2.0, %v418_v21  ;;  %v822_v24 = vpop.f32.mrb[1].mxu0  ;;  %v828_v25 = vpop.f32.mrb[1].mxu1  ;;  %v583_v21 = vld [vmem:[%s1443_s1] sm:$0xf] (!%p804_p1) }
 0x16f   : > { %v375_v26 = vpop.f32.mrb[2].mxu0  ;;  %v421_v27 = vpop.f32.mrb[2].mxu1 }
 0x170   : > { %v379_v28 = vsel %vm328_vm2, -1e+30, %v378_v22  ;;  %v823_v29 = vpop.f32.mrb[3].mxu0  ;;  %v829_v30 = vpop.f32.mrb[3].mxu1  ;;  %v585_v22 = vld [vmem:[%s1450_s0] sm:$0xf] (!%p804_p1) }
 0x171   : > { %v425_v31 = vmax.f32 %v379_v28, %v424_v23  ;;  %v586_v24 = vunpack.c.l.bf16 (!%p804_p1), %v585_v22 }
 0x173   : > { %v427_v32 = vsel %vm426_vm3, %v425_v31, -inf }
 0x174   : > { %428 = vmax.xlane.f32.xlu0 %v427_v32 }
 0x175   : > { %v497_v33 = vpop.f32.mrb[4].mxu0  ;;  %v542_v34 = vpop.f32.mrb[4].mxu1 }
 0x176   : > { %v503_v35 = vmul.f32 2.0, %v497_v33  ;;  %v548_v36 = vmul.f32 2.0, %v542_v34  ;;  %v834_v37 = vpop.f32.mrb[5].mxu0  ;;  %v840_v38 = vpop.f32.mrb[5].mxu1 }
 0x177   : > { %v500_v39 = vpop.f32.mrb[6].mxu0  ;;  %v545_v40 = vpop.f32.mrb[6].mxu1 }
 0x178   : > { %v549_v41 = vsel %vm328_vm2, -1e+30, %v548_v36  ;;  %v835_v42 = vpop.f32.mrb[7].mxu0  ;;  %v841_v43 = vpop.f32.mrb[7].mxu1 }
 0x179   : > { %v550_v44 = vmax.f32 %v503_v35, %v549_v41 }
 0x17b   : > { %v551_v45 = vsel %vm426_vm3, %v550_v44, -inf }
 0x17c   : > { %552 = vmax.xlane.f32.xlu0 %v551_v45 }
 0x201   : > { %v429_v48 = vpop.xlane.xlu0 %428 }
 0x202   : > { %v431_v49 = vmax.f32 %v430_v47, %v429_v48 }
 0x204   : > { %v445_v50 = vsub.f32 %v430_v47, %v431_v49  ;;  %454 = vst [vmem:[#allocation2] sm:$0xff] %v431_v49  ;;  %434 = vperm.xlu1 %952, %v431_v49  }
 0x206   : > { %v446_v9 = vmul.f32 1.442695, %v445_v50 }
 0x209   : > { %v553_v52 = vpop.xlane.xlu0 %552 }
 0x20a   : > { %v555_v53 = vmax.f32 %v554_v51, %v553_v52 }
 0x20b   : > { %v592_v33 = vld [vmem:[#allocation2] sm:$0xff] (!%p804_p1) }
 0x20c   : > { %v569_v54 = vsub.f32 %v554_v51, %v555_v53  ;;  %578 = vst [vmem:[#allocation4] sm:$0xff] %v555_v53  ;;  %558 = vperm.xlu1 %952, %v555_v53  }
 0x20e   : > { %v570_v10 = vmul.f32 1.442695, %v569_v54 }
 0x213   : > { %v597_v34 = vld [vmem:[#allocation4] sm:$0xff] (!%p804_p1) }
 0x283   : > { %v435_v55 = vpop.permute.xlu1 %434 }
 0x284   : > { %v437_v56 = vsub.f32 %v379_v28, %v435_v55  ;;  %v440_v57 = vsub.f32 %v424_v23, %v435_v55  ;;  %v584_v23 = vunpack.c.l.bf16 (!%p804_p1), %v583_v21 }
 0x286   : > { %v438_v58 = vmul.f32 1.442695, %v437_v56  ;;  %v441_v59 = vmul.f32 1.442695, %v440_v57  ;;  %v587_v25 = vmul.f32 (!%p804_p1), %v586_v24, %v584_v23 }
 0x288   : > { %954 = vpow2.f32 %v438_v58  ;;  %v588_v26 = vsel (!%p804_p1), %vm331_vm0, %v587_v25, 0.0 }
 0x289   : > { %956 = vpow2.f32 %v441_v59 }
 0x28b   : > { %v559_v60 = vpop.permute.xlu1 %558 }
 0x28c   : > { %v561_v61 = vsub.f32 %v503_v35, %v559_v60  ;;  %v564_v62 = vsub.f32 %v549_v41, %v559_v60 }
 0x28e   : > { %v562_v63 = vmul.f32 1.442695, %v561_v61  ;;  %v565_v0 = vmul.f32 1.442695, %v564_v62 }
 0x290   : > { %958 = vpow2.f32 %v562_v63 }
 0x291   : > { %960 = vpow2.f32 %v565_v0 }
 0x292   : > { %v955_v1 = vpop.eup %954  ;;  %962 = vpow2.f32 %v446_v9 }
 0x293   : > { %v957_v2 = vpop.eup %956  ;;  %964 = vpow2.f32 %v570_v10 }
 0x294   : > { %v443_v3 = vadd.f32 %v957_v2, %v955_v1 }
 0x296   : > { %v449_v4 = vsel %vm426_vm3, %v443_v3, 0.0 }
 0x297   : > { %450 = vadd.xlane.f32.xlu0 %v449_v4 }
 0x29a   : > { %v959_v5 = vpop.eup %958 }
 0x29b   : > { %v961_v6 = vpop.eup %960  ;;  %589 = vadd.xlane.f32.xlu0 (!%p804_p1), %v588_v26 }
 0x29c   : > { %v567_v7 = vadd.f32 %v961_v6, %v959_v5  ;;  %v963_v11 = vpop.eup %962 }
 0x29d   : > { %v448_v13 = vmul.f32 %v963_v11, %v444_v12  ;;  %v965_v16 = vpop.eup %964 }
 0x29e   : > { %v573_v8 = vsel %vm426_vm3, %v567_v7, 0.0  ;;  %v572_v18 = vmul.f32 %v965_v16, %v568_v17 }
 0x29f   : > { %574 = vadd.xlane.f32.xlu1 %v573_v8 }
 0x324   : > { %v451_v14 = vpop.xlane.xlu0 %450 }
 0x325   : > { %v452_v15 = vadd.f32 %v451_v14, %v448_v13 }
 0x327   : > { %453 = vst [vmem:[#allocation3] sm:$0xff] %v452_v15 }
 0x328   : > { %v590_v37 = vpop.xlane.xlu0 (!%p804_p1), %589 }
 0x329   : > { %582 = sbr.rel (%p804_p1) target bundleno = 841 (0x349), region = 56  ;;  %v591_v38 = vmul.f32 (!%p804_p1), 2.0, %v590_v37 }
 0x32c   : > { %v575_v19 = vpop.xlane.xlu1 %574 }
 0x32d   : > { %v576_v20 = vadd.f32 %v575_v19, %v572_v18 }
 0x32e   : > { %v593_v27 = vld [vmem:[#allocation3] sm:$0xff] (!%p804_p1) }
 0x32f   : > { %577 = vst [vmem:[#allocation5] sm:$0xff] %v576_v20  ;;  %966 = vlog2.f32 (!%p804_p1), %v593_v27 }
 0x336   : > { %v598_v28 = vld [vmem:[#allocation5] sm:$0xff] }
 0x337   : > { %968 = vlog2.f32 %v598_v28 }
 0x339   : > { %v967_v29 = vpop.eup %966 }
 0x33a   : > { %v595_v31 = vmul.f32 0.6931472, %v967_v29 }
 0x33c   : > { %v596_v35 = vadd.f32 %v595_v31, %v592_v33 }
 0x33e   : > { %v602_v39 = vsub.f32 %v596_v35, %v591_v38 }
 0x340   : > { %604 = vst.msk [vmem:[%s1469_s9] sm:$0xff] %vm603_vm4, %v602_v39 }
 0x341   : > { %v969_v30 = vpop.eup %968 }
 0x342   : > { %v600_v32 = vmul.f32 0.6931472, %v969_v30 }
 0x344   : > { %v601_v36 = vadd.f32 %v600_v32, %v597_v34 }
 0x346   : > { %v605_v40 = vsub.f32 %v601_v36, %v591_v38 }
 0x348   : > { %805 = vst.msk [vmem:[%s1469_s9 + $0x8] sm:$0xff] %vm603_vm4, %v605_v40 }
 0x349 PF: > { %p1578_p5 = scmp.ne.s32.totalorder %s1559_s30, 0 }
 0x34a   : > { %s1579_s5 = sld [smem:[#allocation18_spill]] (%p1578_p5)  ;;  %v646_v41 = vld [vmem:[%s1469_s9] sm:$0xff] (%p1578_p5) }
 0x34b   : > { %614 = sbr.rel (!%p1578_p5) target bundleno = 850 (0x352), region = 60 }
 0x34f   : > { %v648_v42 = vld [vmem:[%s1469_s9 + $0x8] sm:$0xff] (%p1578_p5) }
 0x350   : > { %s616_s28 = scalar_lea.vmem (%p1578_p5), %s1579_s5, %s798_s15 }
 0x351   : > { %647 = vst [vmem:[%s616_s28] sm:$0xff] (%p1578_p5), %v646_v41  ;;  %649 = vst [vmem:[%s616_s28 + $0x10] sm:$0xff] (%p1578_p5), %v648_v42 }
 0x352 PF: > { %s20_s25 = sadd.s32 1, %s1158_s25   ;;  %s1580_s30 = sld [smem:[#allocation15_spill]] }
 0x353   : > { %p17_p3 = scmp.ge.s32.totalorder %s20_s25, 6   ;;  %s1581_s15 = smov %s1122_s16 }
 0x354   : > { %s1582_s16 = smov %s1126_s17  ;;  %s1583_s17 = smov %s1389_s14 }
 0x355   : > { %s1584_s18 = smov %s1134_s19  ;;  %s1585_s19 = smov %s1138_s20 }
 0x356   : > { %s1586_s20 = smov %s1402_s12  ;;  %s1587_s21 = smov %s1150_s23 }
 0x357   : > { %s1588_s22 = smov %s1154_s24  ;;  %s1590_s24 = smov %s1596_s7 }
 0x358   : > { %s1589_s23 = smov %s1580_s30  ;;  %19 = sbr.rel (!%p17_p3) target bundleno = 13 (0xd), region = 150 }
 0x35f   :  { %665 = vsyncpa [#allocation7], 1 }
 0x360   :  { %667 = vsyncpa [#allocation7 + $0x1], 1 }
 0x361   :  { %668 = vsyncpa [#allocation9], 1 }
 0x362   :  { %670 = vsyncpa [#allocation9 + $0x1], 1 }

</bundles_post_ra>
